<compile_context>
chip_gen: v7x
topology: tpu7x:2x2x1
jax: 0.10.0
libtpu: 0.0.40
codegen_flags: <defaults>
</compile_context>

<pallas_src>
import functools
import math

import jax
import jax.numpy as jnp
from jax.experimental import pallas as pl
from jax.experimental.pallas import tpu as pltpu


def _round_up(x: int, m: int) -> int:
    return ((x + m - 1) // m) * m


def _cdiv(a: int, b: int) -> int:
    return -(-a // b)


def _vmem_budget() -> int:
    """~85% of per-core VMEM (headroom for compiler temps / DMA bookkeeping).
    v5e/v6e: ~109 of 128 MiB, v7x: ~54 of 64 MiB."""
    try:
        cap = int(pltpu.get_tpu_info().vmem_capacity_bytes)
    except Exception:  # hardware-info query only; cannot mask kernel errors
        cap = 64 << 20  # conservative default = smallest current part (v7x)
    return int(cap * 0.85)


# ----------------------------------------------------------------------------
# Path 1: one-hot matmul (small charset), lane-dense packed output
# ----------------------------------------------------------------------------

def _onehot_kernel(tok_ref, emb_ref, out_ref, *, scale, v_pad, pack, vocab):
    # tok_ref: (rows, pack) int32    emb_ref: (pack*v_pad, out_cols)
    # out_ref: (rows, out_cols)  with out_cols a multiple of 128 (unmasked stores)
    tok = tok_ref[...]
    if pl.debug_checks_enabled():
        pl.debug_check(jnp.all((tok >= 0) & (tok < vocab)),
                       "TokenEmbedding: token id out of range")
    rows = tok.shape[0]
    ids = jax.lax.broadcasted_iota(jnp.int32, (rows, v_pad), 1)
    acc = None
    for q in range(pack):  # static unroll; pack = 128 // D (or 1)
        # sqrt(D) folded into the one-hot -> no epilogue multiply on the VPU.
        sel = jnp.where(ids == tok[:, q:q + 1],
                        jnp.float32(scale), jnp.float32(0.0)).astype(emb_ref.dtype)
        part = jnp.dot(sel, emb_ref[q * v_pad:(q + 1) * v_pad, :],
                       preferred_element_type=jnp.float32)
        acc = part if acc is None else acc + part
    out_ref[...] = acc.astype(out_ref.dtype)


def _onehot_path(tokens, weight, N, B, S, scale, block_tokens, budget):
    V, D = weight.shape
    dt = weight.dtype
    itemsize = jnp.dtype(dt).itemsize

    if D % 128 == 0:
        pack, d_cols = 1, D
    elif 128 % D == 0:
        pack, d_cols = 128 // D, D          # pack `pack` tokens per 128-lane output row
    else:
        pack, d_cols = 1, _round_up(D, 128)  # zero-pad table columns -> lane-dense stores
    out_cols = 128 if pack > 1 else d_cols
    v_pad = _round_up(V, 128)
    granule = 8 * pack                       # keeps (rows, *) blocks sublane-aligned

    # Tail-waste-aware tile choice; expose >= 2 grid steps for the 2 TCs on v7x.
    g = max(1, _cdiv(N, block_tokens))
    if g == 1 and N >= 2 * granule:
        g = 2
    block = _round_up(max(granule, _cdiv(N, g)), granule)

    def vmem_needed(blk):
        rows = blk // pack
        return (2 * rows * 128 * 4                                # token tiles (lane-padded)
                + 2 * pack * v_pad * _round_up(out_cols, 128) * itemsize  # table (2 buffers)
                + 2 * rows * out_cols * itemsize                  # output tiles (lane-dense)
                + 3 * rows * v_pad * 4                            # iota / one-hot / staging
                + (4 << 20))                                      # headroom
    while block > granule and vmem_needed(block) > budget:
        block = max(granule, _round_up(block // 2, granule))

    N_pad = _round_up(N, block)
    rows_total = N_pad // pack
    rows_blk = block // pack

    tok2d = jnp.pad(tokens.reshape(-1).astype(jnp.int32),
                    (0, N_pad - N)).reshape(rows_total, pack)

    # Column-shifted / zero-padded table: block q holds W in columns [q*D, (q+1)*D).
    w_blocks = []
    for q in range(pack):
        left = q * D if pack > 1 else 0
        w_blocks.append(jnp.pad(weight, ((0, v_pad - V), (left, out_cols - D - left))))
    w_cat = jnp.concatenate(w_blocks, axis=0) if pack > 1 else w_blocks[0]

    kernel = functools.partial(_onehot_kernel, scale=scale, v_pad=v_pad,
                               pack=pack, vocab=V)

    out = pl.pallas_call(
        kernel,
        out_shape=jax.ShapeDtypeStruct((rows_total, out_cols), dt),
        grid_spec=pltpu.PrefetchScalarGridSpec(
            num_scalar_prefetch=0,
            grid=(N_pad // block,),
            in_specs=[
                pl.BlockSpec((rows_blk, pack), lambda i: (i, 0)),
                pl.BlockSpec((pack * v_pad, out_cols), lambda i: (0, 0)),
            ],
            out_specs=pl.BlockSpec((rows_blk, out_cols), lambda i: (i, 0)),
        ),
        compiler_params=pltpu.CompilerParams(
            dimension_semantics=("parallel",),
            vmem_limit_bytes=int(min(max(vmem_needed(block), 32 << 20), budget)),
        ),
        cost_estimate=pl.CostEstimate(
            flops=2 * N_pad * v_pad * out_cols,
            transcendentals=0,
            bytes_accessed=(N_pad * 4 + pack * v_pad * out_cols * itemsize
                            + rows_total * out_cols * itemsize),
        ),
    )(tok2d, w_cat)

    # (rows_total, out_cols) and (N_pad, d_cols) share the same linear HBM layout,
    # so the wrapper-side reshape/slice is free layout plumbing.
    return out.reshape(N_pad, d_cols)[:N, :D].reshape(B, S, D)


# ----------------------------------------------------------------------------
# Path 2: HBM row-gather (large vocab, D % 128 == 0)
# ----------------------------------------------------------------------------

def _gather_kernel(tok_ref, w_hbm, out_ref, rows_vmem, sem, *, scale, block, window):
    # tok_ref: (N_pad,) int32 in SMEM (scalar prefetch)     w_hbm: (V, D) in HBM
    # rows_vmem: (block, D) VMEM scratch                     out_ref: (block, D)
    base = pl.program_id(0) * block

    def start_row(r):
        tid = tok_ref[base + r]
        pltpu.make_async_copy(w_hbm.at[pl.ds(tid, 1), :],
                              rows_vmem.at[pl.ds(r, 1), :],
                              sem.at[0]).start()

    @pl.loop(0, window)                 # prime a bounded window of outstanding DMAs
    def _(r):
        start_row(r)

    @pl.loop(0, block)
    def _(r):
        # All row copies have identical shape; one wait retires one copy.
        pltpu.make_async_copy(w_hbm.at[pl.ds(0, 1), :],
                              rows_vmem.at[pl.ds(0, 1), :],
                              sem.at[0]).wait()

        @pl.when(r + window < block)
        def _():
            start_row(r + window)

    out_ref[...] = (jnp.float32(scale) * rows_vmem[...]).astype(out_ref.dtype)


def _gather_path(tokens, weight, N, B, S, scale, block_tokens, budget):
    V, D = weight.shape
    dt = weight.dtype
    itemsize = jnp.dtype(dt).itemsize
    granule = 8
    block_cap = min(block_tokens, 512)   # rows gathered (= DMAs issued) per grid step

    g = max(1, _cdiv(N, block_cap))
    if g == 1 and N >= 2 * granule:
        g = 2                            # let ("parallel",) use both TCs on v7x
    block = _round_up(max(granule, _cdiv(N, g)), granule)

    def vmem_needed(blk):
        return blk * D * itemsize + 2 * blk * D * itemsize + (2 << 20)
    while block > granule and vmem_needed(block) > budget:
        block = max(granule, _round_up(block // 2, granule))

    N_pad = _round_up(N, block)
    window = min(16, block)
    tok_flat = jnp.pad(tokens.reshape(-1).astype(jnp.int32), (0, N_pad - N))

    kernel = functools.partial(_gather_kernel, scale=scale, block=block, window=window)

    out = pl.pallas_call(
        kernel,
        out_shape=jax.ShapeDtypeStruct((N_pad, D), dt),
        grid_spec=pltpu.PrefetchScalarGridSpec(
            num_scalar_prefetch=1,
            grid=(N_pad // block,),
            in_specs=[pl.BlockSpec(memory_space=pl.ANY)],       # table stays in HBM
            out_specs=pl.BlockSpec((block, D), lambda i, tok: (i, 0)),
            scratch_shapes=[pltpu.VMEM((block, D), dt),
                            pltpu.SemaphoreType.DMA((1,))],
        ),
        compiler_params=pltpu.CompilerParams(
            dimension_semantics=("parallel",),
            vmem_limit_bytes=int(min(max(vmem_needed(block), 32 << 20), budget)),
        ),
        cost_estimate=pl.CostEstimate(
            flops=N_pad * D,
            transcendentals=0,
            bytes_accessed=N_pad * 4 + 2 * N_pad * D * itemsize,
        ),
    )(tok_flat, weight)

    return out[:N].reshape(B, S, D)


# ----------------------------------------------------------------------------
# Dispatch
# ----------------------------------------------------------------------------

def token_embedding(tokens, weight, *, block_tokens=1024, path="auto", table_dtype=None):
    """tokens: (B, S) int, weight: (V, D) float -> (B, S, D) in the table dtype.

    table_dtype: optionally cast the table (e.g. jnp.bfloat16) for ~3-4x MXU
    throughput and half the table footprint; output then carries that dtype.
    """
    if path not in ("auto", "onehot", "gather"):
        raise ValueError(f"unknown path {path!r}")
    if table_dtype is not None:
        weight = weight.astype(table_dtype)

    B, S = tokens.shape
    V, D = weight.shape
    N = B * S
    scale = math.sqrt(D)
    itemsize = jnp.dtype(weight.dtype).itemsize
    budget = _vmem_budget()

    table_vmem = 2 * _round_up(V, 128) * _round_up(D, 128) * itemsize
    if path == "auto":
        # One-hot FLOPs dominate past a few hundred vocab rows (generation dependent:
        # ~256 on v5e, ~512 on v6e/v7x); the table must also stay comfortably resident.
        use_gather = (D % 128 == 0) and (V >= 512 or table_vmem > 0.6 * budget)
    else:
        use_gather = (path == "gather")
    if use_gather and D % 128 != 0:
        use_gather = False  # TODO(synk): row-gather for lane-unaligned D.

    if use_gather:
        return _gather_path(tokens, weight, N, B, S, scale, block_tokens, budget)
    return _onehot_path(tokens, weight, N, B, S, scale, block_tokens, budget)


if __name__ == "__main__":
    key = jax.random.PRNGKey(0)
    k_w, k_t, k_w2, k_t2 = jax.random.split(key, 4)

    # --- small OCR-like config (one-hot matmul path, packed lane-dense output) ---
    charset_size, embed_dim, B, S = 40, 32, 2, 8
    weight = jax.random.normal(k_w, (charset_size, embed_dim), dtype=jnp.float32)
    tokens = jax.random.randint(k_t, (B, S), 0, charset_size, dtype=jnp.int32)
    out = jax.block_until_ready(token_embedding(tokens, weight))
    ref = math.sqrt(embed_dim) * weight[tokens]
    assert out.shape == (B, S, embed_dim), out.shape
    assert jnp.allclose(out, ref, atol=1e-5, rtol=1e-5), "one-hot path mismatch"

    # --- larger-vocab config exercising the HBM row-gather path ---
    V2, D2, B2, S2 = 640, 256, 2, 64
    weight2 = jax.random.normal(k_w2, (V2, D2), dtype=jnp.float32)
    tokens2 = jax.random.randint(k_t2, (B2, S2), 0, V2, dtype=jnp.int32)
    out2 = jax.block_until_ready(token_embedding(tokens2, weight2))
    ref2 = math.sqrt(D2) * weight2[tokens2]
    assert out2.shape == (B2, S2, D2), out2.shape
    assert jnp.allclose(out2, ref2, atol=1e-5, rtol=1e-5), "gather path mismatch"

    print("KERNEL_OK")
</pallas_src>

<mosaic_0001>
module attributes {stable_mosaic.version = 11 : i64} {
  func.func @_onehot_kernel(%arg0: i32, %arg1: memref<8x4xi32, #tpu.memory_space<vmem>>, %arg2: memref<512x128xf32, #tpu.memory_space<vmem>>, %arg3: memref<8x128xf32, #tpu.memory_space<vmem>>) attributes {dimension_semantics = [#tpu.dimension_semantics<parallel>], iteration_bounds = array<i64: 1>, scalar_prefetch = 0 : i64, scratch_operands = 0 : i64, tpu.core_type = #tpu.core_type<tc>, window_params = [{transform_indices = @transform_0, window_bounds = array<i64: 8, 4>}, {pipeline_mode = #tpu.pipeline_mode<synchronous>, transform_indices = @transform_1, window_bounds = array<i64: 512, 128>}, {transform_indices = @transform_2, window_bounds = array<i64: 8, 128>}]} {
    %c0 = arith.constant 0 : index
    %c0_0 = arith.constant 0 : index
    %0 = vector.load %arg1[%c0, %c0_0] : memref<8x4xi32, #tpu.memory_space<vmem>>, vector<8x4xi32>
    %1 = tpu.iota {dimensions = array<i32: 1>} : vector<8x128xi32>
    %2 = vector.extract_strided_slice %0 {offsets = [0, 0], sizes = [8, 1], strides = [1, 1]} : vector<8x4xi32> to vector<8x1xi32>
    %3 = vector.broadcast %2 : vector<8x1xi32> to vector<8x128xi32>
    %4 = arith.cmpi eq, %1, %3 : vector<8x128xi32>
    %cst = arith.constant 5.65685415 : f32
    %cst_1 = arith.constant 0.000000e+00 : f32
    %5 = vector.broadcast %cst : f32 to vector<8x128xf32>
    %6 = vector.broadcast %cst_1 : f32 to vector<8x128xf32>
    %7 = arith.select %4, %5, %6 : vector<8x128xi1>, vector<8x128xf32>
    %c0_2 = arith.constant 0 : index
    %c0_3 = arith.constant 0 : index
    %8 = vector.load %arg2[%c0_2, %c0_3] : memref<512x128xf32, #tpu.memory_space<vmem>>, vector<128x128xf32>
    %cst_4 = arith.constant dense<0.000000e+00> : vector<8x128xf32>
    %9 = tpu.matmul %7, %8, %cst_4 {dimension_numbers = #tpu.dot_dimension_numbers<[1], [0], [0], [1], [0, 0, 1, 1], [], []>} : vector<8x128xf32>, vector<128x128xf32>, vector<8x128xf32> -> vector<8x128xf32>
    %10 = vector.extract_strided_slice %0 {offsets = [0, 1], sizes = [8, 1], strides = [1, 1]} : vector<8x4xi32> to vector<8x1xi32>
    %11 = vector.broadcast %10 : vector<8x1xi32> to vector<8x128xi32>
    %12 = arith.cmpi eq, %1, %11 : vector<8x128xi32>
    %cst_5 = arith.constant 5.65685415 : f32
    %cst_6 = arith.constant 0.000000e+00 : f32
    %13 = vector.broadcast %cst_5 : f32 to vector<8x128xf32>
    %14 = vector.broadcast %cst_6 : f32 to vector<8x128xf32>
    %15 = arith.select %12, %13, %14 : vector<8x128xi1>, vector<8x128xf32>
    %c128 = arith.constant 128 : index
    %c0_7 = arith.constant 0 : index
    %16 = vector.load %arg2[%c128, %c0_7] : memref<512x128xf32, #tpu.memory_space<vmem>>, vector<128x128xf32>
    %cst_8 = arith.constant dense<0.000000e+00> : vector<8x128xf32>
    %17 = tpu.matmul %15, %16, %cst_8 {dimension_numbers = #tpu.dot_dimension_numbers<[1], [0], [0], [1], [0, 0, 1, 1], [], []>} : vector<8x128xf32>, vector<128x128xf32>, vector<8x128xf32> -> vector<8x128xf32>
    %18 = arith.addf %9, %17 : vector<8x128xf32>
    %19 = vector.extract_strided_slice %0 {offsets = [0, 2], sizes = [8, 1], strides = [1, 1]} : vector<8x4xi32> to vector<8x1xi32>
    %20 = vector.broadcast %19 : vector<8x1xi32> to vector<8x128xi32>
    %21 = arith.cmpi eq, %1, %20 : vector<8x128xi32>
    %cst_9 = arith.constant 5.65685415 : f32
    %cst_10 = arith.constant 0.000000e+00 : f32
    %22 = vector.broadcast %cst_9 : f32 to vector<8x128xf32>
    %23 = vector.broadcast %cst_10 : f32 to vector<8x128xf32>
    %24 = arith.select %21, %22, %23 : vector<8x128xi1>, vector<8x128xf32>
    %c256 = arith.constant 256 : index
    %c0_11 = arith.constant 0 : index
    %25 = vector.load %arg2[%c256, %c0_11] : memref<512x128xf32, #tpu.memory_space<vmem>>, vector<128x128xf32>
    %cst_12 = arith.constant dense<0.000000e+00> : vector<8x128xf32>
    %26 = tpu.matmul %24, %25, %cst_12 {dimension_numbers = #tpu.dot_dimension_numbers<[1], [0], [0], [1], [0, 0, 1, 1], [], []>} : vector<8x128xf32>, vector<128x128xf32>, vector<8x128xf32> -> vector<8x128xf32>
    %27 = arith.addf %18, %26 : vector<8x128xf32>
    %28 = vector.extract_strided_slice %0 {offsets = [0, 3], sizes = [8, 1], strides = [1, 1]} : vector<8x4xi32> to vector<8x1xi32>
    %29 = vector.broadcast %28 : vector<8x1xi32> to vector<8x128xi32>
    %30 = arith.cmpi eq, %1, %29 : vector<8x128xi32>
    %cst_13 = arith.constant 5.65685415 : f32
    %cst_14 = arith.constant 0.000000e+00 : f32
    %31 = vector.broadcast %cst_13 : f32 to vector<8x128xf32>
    %32 = vector.broadcast %cst_14 : f32 to vector<8x128xf32>
    %33 = arith.select %30, %31, %32 : vector<8x128xi1>, vector<8x128xf32>
    %c384 = arith.constant 384 : index
    %c0_15 = arith.constant 0 : index
    %34 = vector.load %arg2[%c384, %c0_15] : memref<512x128xf32, #tpu.memory_space<vmem>>, vector<128x128xf32>
    %cst_16 = arith.constant dense<0.000000e+00> : vector<8x128xf32>
    %35 = tpu.matmul %33, %34, %cst_16 {dimension_numbers = #tpu.dot_dimension_numbers<[1], [0], [0], [1], [0, 0, 1, 1], [], []>} : vector<8x128xf32>, vector<128x128xf32>, vector<8x128xf32> -> vector<8x128xf32>
    %36 = arith.addf %27, %35 : vector<8x128xf32>
    %c0_17 = arith.constant 0 : index
    %c0_18 = arith.constant 0 : index
    %37 = vector.load %arg3[%c0_17, %c0_18] : memref<8x128xf32, #tpu.memory_space<vmem>>, vector<8x128xf32>
    tpu.vector_store %arg3[%c0_17, %c0_18], %36 {strides = array<i32>} : memref<8x128xf32, #tpu.memory_space<vmem>>, vector<8x128xf32>,
    return
  }
  func.func @transform_0(%arg0: i32) -> (i32, i32) {
    %c0_i32 = arith.constant 0 : i32
    %c0_i32_0 = arith.constant 0 : i32
    return %arg0, %c0_i32 : i32, i32
  }
  func.func @transform_1(%arg0: i32) -> (i32, i32) {
    %c0_i32 = arith.constant 0 : i32
    %c0_i32_0 = arith.constant 0 : i32
    %c0_i32_1 = arith.constant 0 : i32
    return %c0_i32, %c0_i32_0 : i32, i32
  }
  func.func @transform_2(%arg0: i32) -> (i32, i32) {
    %c0_i32 = arith.constant 0 : i32
    %c0_i32_0 = arith.constant 0 : i32
    return %arg0, %c0_i32 : i32, i32
  }
}

</mosaic_0001>

<bundles_post_ra>
// kernel: tpu_custom_call.1
= control target key start
LH: loop header
LB: loop body
LE: loop exit
PB: predicated region body
PF: predicated region fallthrough
CT: control target
= control target key end

     0   :  { %7 = vsyncpa [#allocation3], 0  ;;  %s893_s0 = inlined_call_operand.vmem [shape: s32[8,4], index: 0, kind: input, shape index: {}]   ;;  %s894_s1 = inlined_call_operand.hbm [shape: f32[512,128], index: 1, kind: input, shape index: {}]   ;;  %s895_s2 = inlined_call_operand.hbm [shape: f32[8,128], index: 2, kind: output, shape index: {}]  }
   0x1   :  { %8 = vsyncpa [#allocation4], 0  ;;  %s789_s9 = smov [#allocation2]   ;;  %s741_s13 = scalar_lea.hbm %s894_s1, 8192 }
   0x2   :  { %s16_s10 = sshll.u32 %s789_s9, 4  ;;  %p742_p0 = scmp.ne.s32.totalorder %s894_s1, %s741_s13  ;;  %s17_s10 = int_to_ptr.vmem [resolvable:$true] %s16_s10 }
   0x3   :  { %p745_p1 = scmp.lt.u32.totalorder %s741_s13, %s894_s1 }
   0x5   :  { %p747_p2 = pnand %p745_p1, %p742_p0 }
   0x7   :  { %750 = shalt.err (!%p747_p2)
}
   0x8   :  { %s751_s18 = scalar_lea.vmem %s17_s10, 8192  ;;  %p756_p4 = scmp.lt.s32.totalorder %s17_s10, %s17_s10 }
   0x9   :  { %p752_p3 = scmp.ne.s32.totalorder %s17_s10, %s751_s18  ;;  %p757_p5 = scmp.lt.s32.totalorder %s751_s18, %s751_s18 }
   0xb   :  { %p758_p6 = por %p757_p5, %p756_p4 }
   0xd   :  { %p759_p7 = pnand %p758_p6, %p752_p3 }
   0xf   :  { %762 = shalt.err (!%p759_p7)
}
  0x10   :  { %s790_s19 = smov 128   ;;  %s791_s20 = smov 8  }
  0x11   :  { %22 = dma.hbm_to_vmem [thread:$0]  %s894_s1, 8192, %s17_s10, [#allocation3], %s790_s19, %s790_s19, %s791_s20  }
  0x12   :  { %785 = dma.done.wait [#allocation3], 8192  }
  0x13   :  { %786 = vsyncadd [#allocation3], 4294959104  ;;  %v792_v0 = vmov 1   ;;  %v793_v1 = vmov 0   ;;  %v794_v2 = vmov 0.0|0.0   ;;  %v26_v3 = vld [vmem:[%s893_s0] sm:$0xff]  ;;  %v27_v55 = vlaneseq }
  0x14   :  { %736 = vset.pattern.permute.xlu0 %v792_v0  ;;  %738 = vset.pattern.permute.xlu1 %v793_v1  ;;  %v55_v4 = vld [vmem:[#allocation2 + $0x80] sm:$0xff]  ;;  %v56_v5 = vld [vmem:[#allocation2 + $0x88] sm:$0xff]  ;;  %v57_v7 = vld [vmem:[#allocation2 + $0x90] sm:$0xff]  ;;  %vm795_vm0 = vmmov 0   ;;  %v796_v11 = vmov 0.0   ;;  %v797_v18 = vmov 2  }
  0x15   :  { %623 = vmatprep.subr.bf16.mxu1 %v794_v2  ;;  %671 = vmatprep.subr.bf16.mxu0 %v794_v2  ;;  %v624_v6 = vpack.c.bf16 %v56_v5, %v55_v4  ;;  %v58_v8 = vld [vmem:[#allocation2 + $0x98] sm:$0xff]  ;;  %v216_v9 = vld [vmem:[#allocation2 + $0x100] sm:$0xff]  ;;  %v217_v10 = vld [vmem:[#allocation2 + $0x108] sm:$0xff]  ;;  %v798_v19 = vmov 3   ;;  %v853_v58 = vand.u32 127, %v27_v55  ;;  %s800_s0 = smov [#allocation5]  }
  0x16   :  { %51 = vperm.xlu0 %736, %v26_v3   ;;  %30 = vperm.xlu1 %738, %v26_v3   ;;  %v627_v12 = vpack.c.bf16 %v58_v8, %v57_v7  ;;  %v672_v13 = vpack.c.bf16 %v217_v10, %v216_v9  ;;  %v59_v14 = vld [vmem:[#allocation2 + $0xa0] sm:$0xff]  ;;  %v60_v15 = vld [vmem:[#allocation2 + $0xa8] sm:$0xff]  ;;  %v218_v16 = vld [vmem:[#allocation2 + $0x110] sm:$0xff]  ;;  %v799_v1 = vmov 5.656854   ;;  %s402_s1 = sshll.u32 %s800_s0, 4  ;;  %s403_s1 = int_to_ptr.vmem [resolvable:$true] %s402_s1 }
  0x17   :  { %515 = vmatprep.mubr.msk.f32.mxu1 %vm795_vm0, %v796_v11  ;;  %585 = vmatprep.mubr.msk.f32.mxu0 %vm795_vm0, %v796_v11  ;;  %v219_v17 = vld [vmem:[#allocation2 + $0x118] sm:$0xff]  ;;  %v630_v20 = vpack.c.bf16 %v60_v15, %v59_v14  ;;  %v61_v22 = vld [vmem:[#allocation2 + $0xb0] sm:$0xff]  ;;  %v220_v24 = vld [vmem:[#allocation2 + $0x120] sm:$0xff]  ;;  %s763_s25 = scalar_lea.vmem %s403_s1, 128  ;;  %p768_p9 = scmp.lt.s32.totalorder %s403_s1, %s403_s1 }
  0x18   :  { %625 = vmatpush3.bf16.msra.mxu1 %v624_v6  ;;  %673 = vmatpush3.bf16.msra.mxu0 %v672_v13  ;;  %v675_v21 = vpack.c.bf16 %v219_v17, %v218_v16  ;;  %v62_v23 = vld [vmem:[#allocation2 + $0xb8] sm:$0xff]  ;;  %v221_v25 = vld [vmem:[#allocation2 + $0x128] sm:$0xff]  ;;  %v63_v28 = vld [vmem:[#allocation2 + $0xc0] sm:$0xff]  ;;  %p764_p8 = scmp.ne.s32.totalorder %s403_s1, %s763_s25  ;;  %p769_p10 = scmp.lt.s32.totalorder %s763_s25, %s763_s25 }
  0x19   :  { %626 = vmatprep.subr.bf16.mxu1 %v794_v2  ;;  %674 = vmatprep.subr.bf16.mxu0 %v794_v2  ;;  %v633_v26 = vpack.c.bf16 %v62_v23, %v61_v22  ;;  %v678_v27 = vpack.c.bf16 %v221_v25, %v220_v24  ;;  %v64_v29 = vld [vmem:[#allocation2 + $0xc8] sm:$0xff]  ;;  %v222_v30 = vld [vmem:[#allocation2 + $0x130] sm:$0xff]  ;;  %v223_v31 = vld [vmem:[#allocation2 + $0x138] sm:$0xff] }
  0x1a   :  { %737 = vset.pattern.permute.xlu0 %v797_v18  ;;  %739 = vset.pattern.permute.xlu1 %v798_v19  ;;  %v636_v32 = vpack.c.bf16 %v64_v29, %v63_v28  ;;  %v681_v33 = vpack.c.bf16 %v223_v31, %v222_v30  ;;  %v65_v34 = vld [vmem:[#allocation2 + $0xd0] sm:$0xff]  ;;  %v66_v35 = vld [vmem:[#allocation2 + $0xd8] sm:$0xff]  ;;  %v224_v36 = vld [vmem:[#allocation2 + $0x140] sm:$0xff]  ;;  %p770_p11 = por %p769_p10, %p768_p9 }
  0x1b   :  { %212 = vperm.xlu0 %737, %v26_v3   ;;  %304 = vperm.xlu1 %739, %v26_v3   ;;  %v225_v37 = vld [vmem:[#allocation2 + $0x148] sm:$0xff]  ;;  %v639_v38 = vpack.c.bf16 %v66_v35, %v65_v34  ;;  %v67_v40 = vld [vmem:[#allocation2 + $0xe0] sm:$0xff]  ;;  %v226_v42 = vld [vmem:[#allocation2 + $0x150] sm:$0xff] }
  0x1c   :  { %628 = vmatpush3.bf16.msra.mxu1 %v627_v12  ;;  %676 = vmatpush3.bf16.msra.mxu0 %v675_v21  ;;  %v684_v39 = vpack.c.bf16 %v225_v37, %v224_v36  ;;  %v68_v41 = vld [vmem:[#allocation2 + $0xe8] sm:$0xff]  ;;  %v227_v43 = vld [vmem:[#allocation2 + $0x158] sm:$0xff]  ;;  %v69_v46 = vld [vmem:[#allocation2 + $0xf0] sm:$0xff]  ;;  %p771_p12 = pnand %p770_p11, %p764_p8 }
  0x1d   :  { %629 = vmatprep.subr.bf16.mxu1 %v794_v2  ;;  %677 = vmatprep.subr.bf16.mxu0 %v794_v2  ;;  %v642_v44 = vpack.c.bf16 %v68_v41, %v67_v40  ;;  %v687_v45 = vpack.c.bf16 %v227_v43, %v226_v42  ;;  %v70_v47 = vld [vmem:[#allocation2 + $0xf8] sm:$0xff]  ;;  %v228_v48 = vld [vmem:[#allocation2 + $0x160] sm:$0xff]  ;;  %v229_v49 = vld [vmem:[#allocation2 + $0x168] sm:$0xff] }
  0x1e   :  { %v645_v50 = vpack.c.bf16 %v70_v47, %v69_v46  ;;  %v690_v51 = vpack.c.bf16 %v229_v49, %v228_v48  ;;  %v230_v52 = vld [vmem:[#allocation2 + $0x170] sm:$0xff]  ;;  %v231_v53 = vld [vmem:[#allocation2 + $0x178] sm:$0xff]  ;;  %v34_v56 = vld [vmem:[#allocation2] sm:$0xff] }
  0x1f   :  { %740 = vset.pattern.permute.xlu0 %v798_v19  ;;  %v693_v54 = vpack.c.bf16 %v231_v53, %v230_v52  ;;  %v35_v57 = vld [vmem:[#allocation2 + $0x8] sm:$0xff]  ;;  %v36_v61 = vld [vmem:[#allocation2 + $0x10] sm:$0xff]  ;;  %v37_v62 = vld [vmem:[#allocation2 + $0x18] sm:$0xff] }
  0x20   :  { %631 = vmatpush3.bf16.msra.mxu1 %v630_v20  ;;  %679 = vmatpush3.bf16.msra.mxu0 %v678_v27  ;;  %v648_v59 = vpack.c.bf16 %v35_v57, %v34_v56  ;;  %v308_v63 = vld [vmem:[#allocation2 + $0x180] sm:$0xff]  ;;  %v309_v0 = vld [vmem:[#allocation2 + $0x188] sm:$0xff]  ;;  %v651_v3 = vpack.c.bf16 %v37_v62, %v36_v61  ;;  %v310_v8 = vld [vmem:[#allocation2 + $0x190] sm:$0xff] }
  0x21   :  { %632 = vmatprep.subr.bf16.mxu1 %v794_v2  ;;  %680 = vmatprep.subr.bf16.mxu0 %v794_v2  ;;  %v696_v4 = vpack.c.bf16 %v309_v0, %v308_v63  ;;  %v38_v5 = vld [vmem:[#allocation2 + $0x20] sm:$0xff]  ;;  %v39_v6 = vld [vmem:[#allocation2 + $0x28] sm:$0xff]  ;;  %v311_v9 = vld [vmem:[#allocation2 + $0x198] sm:$0xff] }
  0x22   :  { %v654_v10 = vpack.c.bf16 %v39_v6, %v38_v5  ;;  %v699_v12 = vpack.c.bf16 %v311_v9, %v310_v8  ;;  %v40_v13 = vld [vmem:[#allocation2 + $0x30] sm:$0xff]  ;;  %v41_v14 = vld [vmem:[#allocation2 + $0x38] sm:$0xff]  ;;  %v312_v15 = vld [vmem:[#allocation2 + $0x1a0] sm:$0xff] }
  0x23   :  { %v313_v16 = vld [vmem:[#allocation2 + $0x1a8] sm:$0xff]  ;;  %v657_v17 = vpack.c.bf16 %v41_v14, %v40_v13  ;;  %v42_v19 = vld [vmem:[#allocation2 + $0x40] sm:$0xff]  ;;  %v314_v21 = vld [vmem:[#allocation2 + $0x1b0] sm:$0xff] }
  0x24   :  { %634 = vmatpush3.bf16.msra.mxu1 %v633_v26  ;;  %682 = vmatpush3.bf16.msra.mxu0 %v681_v33  ;;  %v702_v18 = vpack.c.bf16 %v313_v16, %v312_v15  ;;  %v43_v20 = vld [vmem:[#allocation2 + $0x48] sm:$0xff]  ;;  %v315_v22 = vld [vmem:[#allocation2 + $0x1b8] sm:$0xff]  ;;  %v44_v25 = vld [vmem:[#allocation2 + $0x50] sm:$0xff] }
  0x25   :  { %635 = vmatprep.subr.bf16.mxu1 %v794_v2  ;;  %683 = vmatprep.subr.bf16.mxu0 %v794_v2  ;;  %v660_v23 = vpack.c.bf16 %v43_v20, %v42_v19  ;;  %v705_v24 = vpack.c.bf16 %v315_v22, %v314_v21  ;;  %v316_v26 = vld [vmem:[#allocation2 + $0x1c0] sm:$0xff]  ;;  %v317_v27 = vld [vmem:[#allocation2 + $0x1c8] sm:$0xff]  ;;  %v319_v33 = vld [vmem:[#allocation2 + $0x1d8] sm:$0xff] }
  0x26   :  { %v708_v29 = vpack.c.bf16 %v317_v27, %v316_v26  ;;  %v46_v30 = vld [vmem:[#allocation2 + $0x60] sm:$0xff]  ;;  %v47_v31 = vld [vmem:[#allocation2 + $0x68] sm:$0xff]  ;;  %v48_v36 = vld [vmem:[#allocation2 + $0x70] sm:$0xff] }
  0x27   :  { %v666_v34 = vpack.c.bf16 %v47_v31, %v46_v30  ;;  %v49_v37 = vld [vmem:[#allocation2 + $0x78] sm:$0xff]  ;;  %v322_v43 = vld [vmem:[#allocation2 + $0x1f0] sm:$0xff] }
  0x28   :  { %637 = vmatpush3.bf16.msra.mxu1 %v636_v32  ;;  %685 = vmatpush3.bf16.msra.mxu0 %v684_v39  ;;  %v318_v32 = vld [vmem:[#allocation2 + $0x1d0] sm:$0xff]  ;;  %v321_v39 = vld [vmem:[#allocation2 + $0x1e8] sm:$0xff]  ;;  %v669_v40 = vpack.c.bf16 %v49_v37, %v48_v36 }
  0x29   :  { %638 = vmatprep.subr.bf16.mxu1 %v794_v2  ;;  %686 = vmatprep.subr.bf16.mxu0 %v794_v2  ;;  %v711_v35 = vpack.c.bf16 %v319_v33, %v318_v32 }
  0x2c   :  { %640 = vmatpush3.bf16.msra.mxu1 %v639_v38  ;;  %688 = vmatpush3.bf16.msra.mxu0 %v687_v45  ;;  %v320_v38 = vld [vmem:[#allocation2 + $0x1e0] sm:$0xff] }
  0x2d   :  { %641 = vmatprep.subr.bf16.mxu1 %v794_v2  ;;  %689 = vmatprep.subr.bf16.mxu0 %v794_v2  ;;  %v714_v42 = vpack.c.bf16 %v321_v39, %v320_v38 }
  0x30   :  { %643 = vmatpush3.bf16.msra.mxu1 %v642_v44  ;;  %691 = vmatpush3.bf16.msra.mxu0 %v690_v51  ;;  %v323_v44 = vld [vmem:[#allocation2 + $0x1f8] sm:$0xff] }
  0x31   :  { %644 = vmatprep.subr.bf16.mxu1 %v794_v2  ;;  %692 = vmatprep.subr.bf16.mxu0 %v794_v2  ;;  %v717_v45 = vpack.c.bf16 %v323_v44, %v322_v43 }
  0x34   :  { %646 = vmatpush3.bf16.msra.mxu1 %v645_v50  ;;  %694 = vmatpush3.bf16.msra.mxu0 %v693_v54 }
  0x35   :  { %647 = vmatprep.subr.bf16.mxu1 %v794_v2  ;;  %695 = vmatprep.subr.bf16.mxu0 %v794_v2 }
  0x95   :  { %v52_v60 = vpop.permute.xlu0 %51  ;;  %v31_v41 = vpop.permute.xlu1 %30 }
  0x96   :  { %vm53_vm1 = vcmp.eq.s32.totalorder %v853_v58, %v52_v60  ;;  %vm32_vm3 = vcmp.eq.s32.totalorder %v853_v58, %v31_v41 }
  0x97   :  { %516 = vmatmul.mubr.msk.f32.vlgmr.msra.gmra.mrb[0].mxu1 %vm53_vm1, %v799_v1 }
  0x98   :  { %649 = vmatpush3.bf16.msra.mxu1 %v648_v59  ;;  %550 = vmatprep.mubr.msk.f32.mxu1 %vm795_vm0, %v796_v11 }
  0x99   :  { %650 = vmatprep.subr.bf16.mxu1 %v794_v2 }
  0x9a   :  { %v213_v7 = vpop.permute.xlu0 %212  ;;  %v305_v46 = vpop.permute.xlu1 %304 }
  0x9b   :  { %vm214_vm2 = vcmp.eq.s32.totalorder %v853_v58, %v213_v7  ;;  %vm306_vm4 = vcmp.eq.s32.totalorder %v853_v58, %v305_v46 }
  0x9c   :  { %652 = vmatpush3.bf16.msra.mxu1 %v651_v3  ;;  %586 = vmatmul.mubr.msk.f32.vlgmr.msra.gmra.mrb[0].mxu0 %vm214_vm2, %v799_v1 }
  0x9d   :  { %697 = vmatpush3.bf16.msra.mxu0 %v696_v4  ;;  %653 = vmatprep.subr.bf16.mxu1 %v794_v2 }
  0x9e   :  { %698 = vmatprep.subr.bf16.mxu0 %v794_v2  ;;  %620 = vmatprep.mubr.msk.f32.mxu0 %vm795_vm0, %v796_v11  ;;  %v45_v11 = vld [vmem:[#allocation2 + $0x58] sm:$0xff] }
  0x9f   :  { %v663_v28 = vpack.c.bf16 %v45_v11, %v44_v25 }
  0xa0   :  { %655 = vmatpush3.bf16.msra.mxu1 %v654_v10 }
  0xa1   :  { %700 = vmatpush3.bf16.msra.mxu0 %v699_v12  ;;  %656 = vmatprep.subr.bf16.mxu1 %v794_v2 }
  0xa2   :  { %701 = vmatprep.subr.bf16.mxu0 %v794_v2 }
  0xa4   :  { %658 = vmatpush3.bf16.msra.mxu1 %v657_v17 }
  0xa5   :  { %703 = vmatpush3.bf16.msra.mxu0 %v702_v18  ;;  %659 = vmatprep.subr.bf16.mxu1 %v794_v2 }
  0xa6   :  { %704 = vmatprep.subr.bf16.mxu0 %v794_v2 }
  0xa8   :  { %661 = vmatpush3.bf16.msra.mxu1 %v660_v23 }
  0xa9   :  { %706 = vmatpush3.bf16.msra.mxu0 %v705_v24  ;;  %662 = vmatprep.subr.bf16.mxu1 %v794_v2 }
  0xaa   :  { %707 = vmatprep.subr.bf16.mxu0 %v794_v2 }
  0xac   :  { %664 = vmatpush3.bf16.msra.mxu1 %v663_v28 }
  0xad   :  { %709 = vmatpush3.bf16.msra.mxu0 %v708_v29  ;;  %665 = vmatprep.subr.bf16.mxu1 %v794_v2 }
  0xae   :  { %710 = vmatprep.subr.bf16.mxu0 %v794_v2 }
  0xb0   :  { %667 = vmatpush3.bf16.msra.mxu1 %v666_v34 }
  0xb1   :  { %712 = vmatpush3.bf16.msra.mxu0 %v711_v35  ;;  %668 = vmatprep.subr.bf16.mxu1 %v794_v2 }
  0xb2   :  { %713 = vmatprep.subr.bf16.mxu0 %v794_v2 }
  0xb4   :  { %670 = vmatpush3.bf16.msra.mxu1 %v669_v40 }
  0xb5   :  { %715 = vmatpush3.bf16.msra.mxu0 %v714_v42 }
  0xb6   :  { %716 = vmatprep.subr.bf16.mxu0 %v794_v2 }
  0xb7   :  { %551 = vmatmul.mubr.msk.f32.vlgmr.msra.gmra.mrb[0].mxu1 %vm32_vm3, %v799_v1 }
  0xb9   :  { %718 = vmatpush3.bf16.msra.mxu0 %v717_v45 }
  0xbc   :  { %621 = vmatmul.mubr.msk.f32.vlgmr.msra.gmra.mrb[0].mxu0 %vm306_vm4, %v799_v1 }
 0x18a   :  { %v207_v47 = vpop.f32.mrb[0].mxu1 }
 0x18b   :  { %v552_v48 = vpop.f32.mrb[1].mxu1 }
 0x18f   :  { %v390_v49 = vpop.f32.mrb[0].mxu0 }
 0x190   :  { %v719_v50 = vadd.f32 %v390_v49, %v207_v47  ;;  %v622_v51 = vpop.f32.mrb[1].mxu0 }
 0x192   :  { %395 = vst [vmem:[#allocation5] sm:$0xff] %v719_v50 }
 0x193   :  { %774 = shalt.err (!%p771_p12)
}
 0x194   :  { %s775_s28 = scalar_lea.hbm %s895_s2, 128 }
 0x195   :  { %p776_p13 = scmp.ne.s32.totalorder %s895_s2, %s775_s28  ;;  %p779_p0 = scmp.lt.u32.totalorder %s775_s28, %s895_s2 }
 0x197   :  { %p781_p1 = pnand %p779_p0, %p776_p13 }
 0x199   :  { %784 = shalt.err (!%p781_p1)
}
 0x19a   :  { %405 = dma.vmem_to_hbm [thread:$0]  %s403_s1, 128, %s895_s2, [#allocation4]  }
 0x19b   :  { %787 = dma.done.wait [#allocation4], 128  }
 0x19c   :  { %788 = vsyncadd [#allocation4], 4294967168 }
 0x19d   :  { %409 = vsyncpa [#allocation3], 1 }
 0x19e   :  { %410 = vsyncpa [#allocation4], 1 }

</bundles_post_ra>
